<compile_context>
chip_gen: v5e
topology: v5e:2x2
jax: 0.10.0
libtpu: 0.0.40
codegen_flags: <defaults>
</compile_context>

<pallas_src>
import jax
import jax.numpy as jnp
from jax import lax
from jax.experimental import pallas as pl
from jax.experimental.pallas import tpu as pltpu


def _make_cross_entropy_kernel(num_classes: int, class_tile: int, mask_cols: bool):
    def kernel(logits_ref, targets_ref, loss_ref, m_ref, l_ref, tgt_ref):
        ct = pl.program_id(1)

        @pl.when(ct == 0)
        def _init():
            m_ref[...] = jnp.full_like(m_ref, -jnp.inf)
            l_ref[...] = jnp.zeros_like(l_ref)
            tgt_ref[...] = jnp.zeros_like(tgt_ref)

        # Upcast once; keep all math in f32 (no bf16 VPU/EUP on v5e).
        x = logits_ref[...].astype(jnp.float32)           # (TB, TC)
        t = targets_ref[...]                              # (TB, 1) int32 labels

        col = ct * class_tile + lax.broadcasted_iota(jnp.int32, x.shape, 1)
        if mask_cols:
            # Ragged last class tile: out-of-range columns read unspecified data;
            # mask them to a huge negative so they vanish under exp().
            x = jnp.where(col < num_classes, x, jnp.float32(-1e30))

        # Fused target-logit gather (one-hot select) — VALU filler that co-issues
        # with the EUP exp / XLU reduces below.
        tgt_ref[...] += jnp.sum(jnp.where(col == t, x, 0.0), axis=-1, keepdims=True)

        # Online (flash-style) logsumexp over class tiles.
        m_prev = m_ref[...]
        m_new = jnp.maximum(m_prev, jnp.max(x, axis=-1, keepdims=True))
        l_ref[...] = (l_ref[...] * jnp.exp(m_prev - m_new)
                      + jnp.sum(jnp.exp(x - m_new), axis=-1, keepdims=True))
        m_ref[...] = m_new

        @pl.when(ct == pl.num_programs(1) - 1)
        def _finalize():
            # -log_softmax(x)[i, t_i], per row; written back once per batch tile.
            loss_ref[...] = m_ref[...] + jnp.log(l_ref[...]) - tgt_ref[...]

    return kernel


def _vmem_budgets():
    """(heuristic VMEM budget for the streamed tile, scoped vmem_limit_bytes)."""
    phys = 64 * 1024 * 1024  # assume the smallest per-core VMEM (v7x) if unknown
    try:
        info = pltpu.get_tpu_info()
        phys = int(getattr(info, "vmem_capacity_bytes", phys)) or phys
    except Exception:
        pass
    budget = min(phys // 5, 24 * 1024 * 1024)              # v5e/v6e ~24 MiB, v7x ~12 MiB
    limit = max(min(phys // 2, 80 * 1024 * 1024), 32 * 1024 * 1024)
    return budget, limit


def _choose_tiles(batch: int, num_classes: int, itemsize: int, budget: int):
    """Pick (block_rows, class_tile) so each step streams multi-MiB of logits
    while the double-buffered tile + live f32/i32 temporaries fit `budget`."""
    # Per logits element resident during a step:
    #   2x HBM-side tile (double-buffered input)                 -> 2 * itemsize
    #   ~4 live (TB, TC) f32/i32 temporaries in the kernel body
    #   (f32 upcast, exp(x - m), column iota, one-hot select)    -> 16 bytes
    bytes_per_elem = 2 * max(itemsize, 1) + 16

    def lane_pad(c):  # VMEM tiles pad the lane axis to 128
        return ((c + 127) // 128) * 128

    if 8 * lane_pad(num_classes) * bytes_per_elem <= budget:
        class_tile = num_classes                            # whole row resident
    else:
        class_tile = 8192                                   # lane-dense online-LSE path
        while class_tile > 2048 and 8 * class_tile * bytes_per_elem > budget:
            class_tile //= 2

    rows = budget // (lane_pad(class_tile) * bytes_per_elem)
    rows = max(8, (rows // 8) * 8)
    rows = min(rows, ((batch + 7) // 8) * 8)                # no artificial 1024-row cap
    return rows, class_tile


def cross_entropy_loss(inputs, targets, *, block_rows=None, class_tile=None):
    """nn.CrossEntropyLoss (mean) over (B, C) logits and (B,) int labels -> f32 scalar."""
    B, C = inputs.shape
    itemsize = jnp.dtype(inputs.dtype).itemsize

    budget, vmem_limit = _vmem_budgets()
    auto_rows, auto_ct = _choose_tiles(B, C, itemsize, budget)
    if block_rows is None:
        block_rows = auto_rows
    else:
        block_rows = min(max(8, ((int(block_rows) + 7) // 8) * 8), ((B + 7) // 8) * 8)
    if class_tile is None:
        class_tile = auto_ct

    num_batch_tiles = -(-B // block_rows)
    num_class_tiles = -(-C // class_tile)
    B_pad = num_batch_tiles * block_rows
    mask_cols = (num_class_tiles * class_tile) != C

    # Targets are tiny: pad them so the scalar side never reads a ragged block.
    tgt2d = targets.astype(jnp.int32).reshape(B, 1)
    if B_pad != B:
        tgt2d = jnp.pad(tgt2d, ((0, B_pad - B), (0, 0)))
    # Logits are deliberately NOT padded (that would double HBM traffic): ragged
    # tail blocks are read as-is; their per-row results land in output rows >= B
    # (output itself is padded to B_pad so no ragged writes) and are sliced off.

    cost = pl.CostEstimate(
        flops=6 * B * C,
        transcendentals=B * C,
        bytes_accessed=B * C * itemsize + B_pad * 4 + B_pad * 4,
    )

    per_row = pl.pallas_call(
        _make_cross_entropy_kernel(C, class_tile, mask_cols),
        out_shape=jax.ShapeDtypeStruct((B_pad, 1), jnp.float32),
        grid_spec=pltpu.PrefetchScalarGridSpec(
            num_scalar_prefetch=0,
            grid=(num_batch_tiles, num_class_tiles),
            in_specs=[
                pl.BlockSpec((block_rows, class_tile), lambda bt, ct: (bt, ct)),
                pl.BlockSpec((block_rows, 1), lambda bt, ct: (bt, 0)),
            ],
            out_specs=pl.BlockSpec((block_rows, 1), lambda bt, ct: (bt, 0)),
            scratch_shapes=[pltpu.VMEM((block_rows, 1), jnp.float32)] * 3,
        ),
        compiler_params=pltpu.CompilerParams(
            # Batch tiles are fully independent (own output block, scratch reset
            # at ct == 0), so they megacore-shard across both TCs on v7x.  The
            # class axis carries the online-LSE state -> reduction axis, last.
            dimension_semantics=("parallel", "arbitrary"),
            vmem_limit_bytes=vmem_limit,
        ),
        cost_estimate=cost,
    )(inputs, tgt2d)

    return jnp.sum(per_row[:B, 0]) / B


def _reference(inputs, targets):
    x = inputs.astype(jnp.float32)
    return jnp.mean(
        jax.nn.logsumexp(x, axis=-1)
        - jnp.take_along_axis(x, targets[:, None], axis=-1)[:, 0]
    )


if __name__ == "__main__":
    key = jax.random.PRNGKey(0)
    k_logits, k_targets = jax.random.split(key)

    # Case 1: base shapes from the module spec (single tile in both axes).
    batch_size, num_classes = 8, 32
    inputs = jax.random.normal(k_logits, (batch_size, num_classes), dtype=jnp.float32)
    targets = jax.random.randint(k_targets, (batch_size,), 0, num_classes, dtype=jnp.int32)
    loss = cross_entropy_loss(inputs, targets)
    jax.block_until_ready(loss)
    ref = _reference(inputs, targets)
    assert jnp.allclose(loss, ref, atol=1e-5, rtol=1e-5), (loss, ref)

    # Case 2: multi-batch-tile grid (forces per-tile scratch reset + parallel axis).
    k2a, k2b = jax.random.split(jax.random.PRNGKey(0), 2)
    inputs2 = jax.random.normal(k2a, (24, num_classes), dtype=jnp.float32)
    targets2 = jax.random.randint(k2b, (24,), 0, num_classes, dtype=jnp.int32)
    loss2 = cross_entropy_loss(inputs2, targets2, block_rows=8)
    jax.block_until_ready(loss2)
    ref2 = _reference(inputs2, targets2)
    assert jnp.allclose(loss2, ref2, atol=1e-5, rtol=1e-5), (loss2, ref2)

    # Case 3: ragged batch (B not a multiple of 8) -> ragged input rows, output
    # padded to B_pad and sliced in the wrapper.
    k3a, k3b = jax.random.split(jax.random.PRNGKey(0), 2)
    inputs3 = jax.random.normal(k3a, (13, num_classes), dtype=jnp.float32)
    targets3 = jax.random.randint(k3b, (13,), 0, num_classes, dtype=jnp.int32)
    loss3 = cross_entropy_loss(inputs3, targets3)
    jax.block_until_ready(loss3)
    ref3 = _reference(inputs3, targets3)
    assert jnp.allclose(loss3, ref3, atol=1e-5, rtol=1e-5), (loss3, ref3)

    # Case 4: class-axis tiling (online LSE) with a ragged class tail -> exercises
    # the flash-style running max/sum path and the in-kernel column mask.
    k4a, k4b = jax.random.split(jax.random.PRNGKey(0), 2)
    inputs4 = jax.random.normal(k4a, (16, 300), dtype=jnp.float32)
    targets4 = jax.random.randint(k4b, (16,), 0, 300, dtype=jnp.int32)
    loss4 = cross_entropy_loss(inputs4, targets4, block_rows=8, class_tile=128)
    jax.block_until_ready(loss4)
    ref4 = _reference(inputs4, targets4)
    assert jnp.allclose(loss4, ref4, atol=1e-5, rtol=1e-5), (loss4, ref4)

    print("KERNEL_OK")
</pallas_src>

<mosaic_0001>
module attributes {stable_mosaic.version = 11 : i64} {
  func.func @kernel(%arg0: i32, %arg1: i32, %arg2: memref<8x32xf32, #tpu.memory_space<vmem>>, %arg3: memref<8x1xi32, #tpu.memory_space<vmem>>, %arg4: memref<8x1xf32, #tpu.memory_space<vmem>>, %arg5: memref<8x1xf32, #tpu.memory_space<vmem>>, %arg6: memref<8x1xf32, #tpu.memory_space<vmem>>, %arg7: memref<8x1xf32, #tpu.memory_space<vmem>>) attributes {dimension_semantics = [#tpu.dimension_semantics<parallel>, #tpu.dimension_semantics<arbitrary>], iteration_bounds = array<i64: 1, 1>, scalar_prefetch = 0 : i64, scratch_operands = 3 : i64, tpu.core_type = #tpu.core_type<tc>, window_params = [{transform_indices = @transform_0, window_bounds = array<i64: 8, 32>}, {transform_indices = @transform_1, window_bounds = array<i64: 8, 1>}, {transform_indices = @transform_2, window_bounds = array<i64: 8, 1>}]} {
    %c0_i32 = arith.constant 0 : i32
    %0 = arith.cmpi eq, %arg1, %c0_i32 : i32
    %1 = arith.extui %0 : i1 to i32
    %c0_i32_0 = arith.constant 0 : i32
    %2 = arith.cmpi ne, %1, %c0_i32_0 : i32
    scf.if %2 {
      %cst_21 = arith.constant 0xFF800000 : f32
      %37 = vector.broadcast %cst_21 : f32 to vector<8x1xf32>
      %c0_22 = arith.constant 0 : index
      %c0_23 = arith.constant 0 : index
      %38 = vector.load %arg5[%c0_22, %c0_23] : memref<8x1xf32, #tpu.memory_space<vmem>>, vector<8x1xf32>
      tpu.vector_store %arg5[%c0_22, %c0_23], %37 {strides = array<i32>} : memref<8x1xf32, #tpu.memory_space<vmem>>, vector<8x1xf32>,
      %cst_24 = arith.constant 0.000000e+00 : f32
      %39 = vector.broadcast %cst_24 : f32 to vector<8x1xf32>
      %c0_25 = arith.constant 0 : index
      %c0_26 = arith.constant 0 : index
      %40 = vector.load %arg6[%c0_25, %c0_26] : memref<8x1xf32, #tpu.memory_space<vmem>>, vector<8x1xf32>
      tpu.vector_store %arg6[%c0_25, %c0_26], %39 {strides = array<i32>} : memref<8x1xf32, #tpu.memory_space<vmem>>, vector<8x1xf32>,
      %cst_27 = arith.constant 0.000000e+00 : f32
      %41 = vector.broadcast %cst_27 : f32 to vector<8x1xf32>
      %c0_28 = arith.constant 0 : index
      %c0_29 = arith.constant 0 : index
      %42 = vector.load %arg7[%c0_28, %c0_29] : memref<8x1xf32, #tpu.memory_space<vmem>>, vector<8x1xf32>
      tpu.vector_store %arg7[%c0_28, %c0_29], %41 {strides = array<i32>} : memref<8x1xf32, #tpu.memory_space<vmem>>, vector<8x1xf32>,
    } else {
    }
    %c0 = arith.constant 0 : index
    %c0_1 = arith.constant 0 : index
    %3 = vector.load %arg2[%c0, %c0_1] : memref<8x32xf32, #tpu.memory_space<vmem>>, vector<8x32xf32>
    %c0_2 = arith.constant 0 : index
    %c0_3 = arith.constant 0 : index
    %4 = vector.load %arg3[%c0_2, %c0_3] : memref<8x1xi32, #tpu.memory_space<vmem>>, vector<8x1xi32>
    %c32_i32 = arith.constant 32 : i32
    %5 = arith.muli %arg1, %c32_i32 : i32
    %6 = tpu.iota {dimensions = array<i32: 1>} : vector<8x32xi32>
    %7 = vector.broadcast %5 : i32 to vector<8x32xi32>
    %8 = arith.addi %7, %6 : vector<8x32xi32>
    %c0_4 = arith.constant 0 : index
    %c0_5 = arith.constant 0 : index
    %9 = vector.load %arg7[%c0_4, %c0_5] : memref<8x1xf32, #tpu.memory_space<vmem>>, vector<8x1xf32>
    %10 = vector.broadcast %4 : vector<8x1xi32> to vector<8x32xi32>
    %11 = arith.cmpi eq, %8, %10 : vector<8x32xi32>
    %cst = arith.constant 0.000000e+00 : f32
    %12 = vector.broadcast %cst : f32 to vector<8x32xf32>
    %13 = arith.select %11, %3, %12 : vector<8x32xi1>, vector<8x32xf32>
    %cst_6 = arith.constant dense<0.000000e+00> : vector<8xf32>
    %14 = vector.multi_reduction <add>, %13, %cst_6 [1] : vector<8x32xf32> to vector<8xf32>
    %15 = vector.shape_cast %14 : vector<8xf32> to vector<8x1xf32>
    %16 = arith.addf %9, %15 : vector<8x1xf32>
    %c0_7 = arith.constant 0 : index
    %c0_8 = arith.constant 0 : index
    %17 = vector.load %arg7[%c0_7, %c0_8] : memref<8x1xf32, #tpu.memory_space<vmem>>, vector<8x1xf32>
    tpu.vector_store %arg7[%c0_7, %c0_8], %16 {strides = array<i32>} : memref<8x1xf32, #tpu.memory_space<vmem>>, vector<8x1xf32>,
    %c0_9 = arith.constant 0 : index
    %c0_10 = arith.constant 0 : index
    %18 = vector.load %arg5[%c0_9, %c0_10] : memref<8x1xf32, #tpu.memory_space<vmem>>, vector<8x1xf32>
    %cst_11 = arith.constant dense<0xFF800000> : vector<8xf32>
    %19 = vector.multi_reduction <maximumf>, %3, %cst_11 [1] : vector<8x32xf32> to vector<8xf32>
    %20 = vector.shape_cast %19 : vector<8xf32> to vector<8x1xf32>
    %21 = arith.maximumf %18, %20 : vector<8x1xf32>
    %c0_12 = arith.constant 0 : index
    %c0_13 = arith.constant 0 : index
    %22 = vector.load %arg6[%c0_12, %c0_13] : memref<8x1xf32, #tpu.memory_space<vmem>>, vector<8x1xf32>
    %23 = arith.subf %18, %21 : vector<8x1xf32>
    %24 = math.exp %23 : vector<8x1xf32>
    %25 = arith.mulf %22, %24 : vector<8x1xf32>
    %26 = vector.broadcast %21 : vector<8x1xf32> to vector<8x32xf32>
    %27 = arith.subf %3, %26 : vector<8x32xf32>
    %28 = math.exp %27 : vector<8x32xf32>
    %cst_14 = arith.constant dense<0.000000e+00> : vector<8xf32>
    %29 = vector.multi_reduction <add>, %28, %cst_14 [1] : vector<8x32xf32> to vector<8xf32>
    %30 = vector.shape_cast %29 : vector<8xf32> to vector<8x1xf32>
    %31 = arith.addf %25, %30 : vector<8x1xf32>
    %c0_15 = arith.constant 0 : index
    %c0_16 = arith.constant 0 : index
    %32 = vector.load %arg6[%c0_15, %c0_16] : memref<8x1xf32, #tpu.memory_space<vmem>>, vector<8x1xf32>
    tpu.vector_store %arg6[%c0_15, %c0_16], %31 {strides = array<i32>} : memref<8x1xf32, #tpu.memory_space<vmem>>, vector<8x1xf32>,
    %c0_17 = arith.constant 0 : index
    %c0_18 = arith.constant 0 : index
    %33 = vector.load %arg5[%c0_17, %c0_18] : memref<8x1xf32, #tpu.memory_space<vmem>>, vector<8x1xf32>
    tpu.vector_store %arg5[%c0_17, %c0_18], %21 {strides = array<i32>} : memref<8x1xf32, #tpu.memory_space<vmem>>, vector<8x1xf32>,
    %c0_i32_19 = arith.constant 0 : i32
    %34 = arith.cmpi eq, %arg1, %c0_i32_19 : i32
    %35 = arith.extui %34 : i1 to i32
    %c0_i32_20 = arith.constant 0 : i32
    %36 = arith.cmpi ne, %35, %c0_i32_20 : i32
    scf.if %36 {
      %c0_21 = arith.constant 0 : index
      %c0_22 = arith.constant 0 : index
      %37 = vector.load %arg5[%c0_21, %c0_22] : memref<8x1xf32, #tpu.memory_space<vmem>>, vector<8x1xf32>
      %c0_23 = arith.constant 0 : index
      %c0_24 = arith.constant 0 : index
      %38 = vector.load %arg6[%c0_23, %c0_24] : memref<8x1xf32, #tpu.memory_space<vmem>>, vector<8x1xf32>
      %39 = math.log %38 : vector<8x1xf32>
      %40 = arith.addf %37, %39 : vector<8x1xf32>
      %c0_25 = arith.constant 0 : index
      %c0_26 = arith.constant 0 : index
      %41 = vector.load %arg7[%c0_25, %c0_26] : memref<8x1xf32, #tpu.memory_space<vmem>>, vector<8x1xf32>
      %42 = arith.subf %40, %41 : vector<8x1xf32>
      %c0_27 = arith.constant 0 : index
      %c0_28 = arith.constant 0 : index
      %43 = vector.load %arg4[%c0_27, %c0_28] : memref<8x1xf32, #tpu.memory_space<vmem>>, vector<8x1xf32>
      tpu.vector_store %arg4[%c0_27, %c0_28], %42 {strides = array<i32>} : memref<8x1xf32, #tpu.memory_space<vmem>>, vector<8x1xf32>,
    } else {
    }
    return
  }
  func.func @transform_0(%arg0: i32, %arg1: i32) -> (i32, i32) {
    %c0_i32 = arith.constant 0 : i32
    return %arg0, %arg1 : i32, i32
  }
  func.func @transform_1(%arg0: i32, %arg1: i32) -> (i32, i32) {
    %c0_i32 = arith.constant 0 : i32
    %c0_i32_0 = arith.constant 0 : i32
    return %arg0, %c0_i32 : i32, i32
  }
  func.func @transform_2(%arg0: i32, %arg1: i32) -> (i32, i32) {
    %c0_i32 = arith.constant 0 : i32
    %c0_i32_0 = arith.constant 0 : i32
    return %arg0, %c0_i32 : i32, i32
  }
}

</mosaic_0001>

<bundles_post_ra>
// kernel: tpu_custom_call.1
= control target key start
LH: loop header
LB: loop body
LE: loop exit
PB: predicated region body
PF: predicated region fallthrough
CT: control target
= control target key end

     0   :  { %vm32_vm0 = vcmask 261120   ;;  %vm15_vm1 = vcmask 7168   ;;  %v89_v1 = vmov -inf   ;;  %v90_v3 = vmov 0   ;;  %s126_s0 = inlined_call_operand.vmem [shape: f32[8,32], index: 0, kind: input, shape index: {}]   ;;  %s127_s1 = inlined_call_operand.vmem [shape: s32[8,1], index: 1, kind: input, shape index: {}]   ;;  %s128_s2 = inlined_call_operand.vmem [shape: f32[8,1], index: 2, kind: output, shape index: {}]  }
   0x1   :  { %v19_v0 = vld [vmem:[%s126_s0] sm:$0xff]  ;;  %16 = vst.msk [vmem:[#allocation2] sm:$0xff] %vm15_vm1, %v89_v1  ;;  %81 = vset.pattern.permute.xlu0 %v90_v3  ;;  %82 = vset.pattern.permute.xlu1 %v90_v3  ;;  %v91_v4 = vmov 0.0   ;;  %v22_v10 = vlaneseq }
   0x2   :  { %v40_v2 = vsel %vm32_vm0, %v19_v0, -inf  ;;  %17 = vst.msk [vmem:[#allocation3] sm:$0xff] %vm15_vm1, %v91_v4  ;;  %v20_v5 = vld [vmem:[%s127_s1] sm:$0xff] }
   0x3   :  { %41 = vmax.xlane.f32.xlu0 %v40_v2  ;;  %18 = vst.msk [vmem:[#allocation4] sm:$0xff] %vm15_vm1, %v91_v4  ;;  %28 = vperm.xlu1 %82, %v20_v5   ;;  %v23_v12 = vand.u32 127, %v22_v10 }
   0x8   :  { %v39_v6 = vld [vmem:[#allocation2] sm:$0xff] }
   0x9   :  { %v44_v25 = vld [vmem:[#allocation3] sm:$0xff] }
   0xa   :  { %v26_v20 = vld [vmem:[#allocation4] sm:$0xff] }
  0x75   :  { %v29_v11 = vpop.permute.xlu1 %28 }
  0x76   :  { %v42_v7 = vpop.xlane.xlu0 %41  ;;  %vm30_vm2 = vcmp.eq.s32.totalorder %v23_v12, %v29_v11 }
  0x77   :  { %v43_v8 = vmax.f32 %v39_v6, %v42_v7  ;;  %v31_v13 = vsel %vm30_vm2, %v19_v0, 0.0 }
  0x78   :  { %v33_v14 = vsel %vm32_vm0, %v31_v13, 0.0 }
  0x79   :  { %v45_v9 = vsub.f32 %v39_v6, %v43_v8  ;;  %62 = vst.msk [vmem:[#allocation2] sm:$0xff] %vm15_vm1, %v43_v8  ;;  %51 = vperm.xlu0 %81, %v43_v8   ;;  %34 = vadd.xlane.f32.xlu2 %v33_v14 }
  0x7b   :  { %v46_v23 = vmul.f32 1.442695, %v45_v9 }
  0x80   :  { %v66_v32 = vld [vmem:[#allocation2] sm:$0xff] }
  0xeb   :  { %v52_v15 = vpop.permute.xlu0 %51 }
  0xec   :  { %v54_v16 = vsub.f32 %v19_v0, %v52_v15  ;;  %v35_v21 = vpop.xlane.xlu2 %34 }
  0xed   :  { %v36_v22 = vadd.f32 %v35_v21, %v26_v20 }
  0xee   :  { %v55_v17 = vmul.f32 1.442695, %v54_v16 }
  0xef   :  { %38 = vst.msk [vmem:[#allocation4] sm:$0xff] %vm15_vm1, %v36_v22 }
  0xf0   :  { %83 = vpow2.f32 %v55_v17 }
  0xf1   :  { %85 = vpow2.f32 %v46_v23 }
  0xf6   :  { %v84_v18 = vpop.eup %83  ;;  %v71_v33 = vld [vmem:[#allocation4] sm:$0xff] }
  0xf7   :  { %v57_v19 = vsel %vm32_vm0, %v84_v18, 0.0  ;;  %v86_v24 = vpop.eup %85 }
  0xf8   :  { %58 = vadd.xlane.f32.xlu1 %v57_v19  ;;  %v48_v26 = vmul.f32 %v86_v24, %v44_v25 }
 0x16b   :  { %v59_v27 = vpop.xlane.xlu1 %58 }
 0x16c   :  { %v60_v28 = vadd.f32 %v59_v27, %v48_v26 }
 0x16e   :  { %61 = vst.msk [vmem:[#allocation3] sm:$0xff] %vm15_vm1, %v60_v28 }
 0x175   :  { %v67_v29 = vld [vmem:[#allocation3] sm:$0xff] }
 0x176   :  { %87 = vlog2.f32 %v67_v29 }
 0x17c   :  { %v88_v30 = vpop.eup %87 }
 0x17d   :  { %v69_v31 = vmul.f32 0.6931472, %v88_v30 }
 0x17f   :  { %v70_v34 = vadd.f32 %v69_v31, %v66_v32 }
 0x181   :  { %v72_v35 = vsub.f32 %v70_v34, %v71_v33 }
 0x183   :  { %73 = vst.msk [vmem:[%s128_s2] sm:$0xff] %vm15_vm1, %v72_v35 }

</bundles_post_ra>
